<compile_context>
chip_gen: v5e
topology: v5e:2x2
jax: 0.10.0
libtpu: 0.0.40
codegen_flags: <defaults>
</compile_context>

<pallas_src>
import functools

import jax
import jax.numpy as jnp
from jax.experimental import pallas as pl
from jax.experimental.pallas import tpu as pltpu


_VMEM_LIMIT = 32 * 1024 * 1024   # safe scoped-VMEM budget on v5e/v6e/v7x


# ----------------------------------------------------------------------------------
# small helpers
# ----------------------------------------------------------------------------------
def _round_up(x, m):
    return ((x + m - 1) // m) * m


def _pick_tile(dim, max_tile, mult):
    """Pick a tile (multiple of `mult`, <= max_tile) minimizing padding; return (padded, tile)."""
    dim_p = _round_up(dim, mult)
    best_t, best_pad = mult, _round_up(dim_p, mult)
    t = mult
    while t <= min(max_tile, dim_p):
        pad = _round_up(dim_p, t)
        if pad < best_pad or (pad == best_pad and t > best_t):
            best_pad, best_t = pad, t
        t += mult
    return best_pad, best_t


def _adaptive_pool_matrix(out_size, in_size):
    """(out_size, in_size) row-stochastic matrix == PyTorch AdaptiveAvgPool1d along one axis."""
    rows = []
    for i in range(out_size):
        start = (i * in_size) // out_size
        end = -((-(i + 1) * in_size) // out_size)   # ceil((i+1)*in/out)
        row = [0.0] * in_size
        for j in range(start, end):
            row[j] = 1.0 / (end - start)
        rows.append(row)
    return jnp.array(rows, jnp.float32)


def _interp_matrix(out_size, in_size):
    """(out_size, in_size) 1-D bilinear interpolation matrix, align_corners=True."""
    if in_size == 1:
        return jnp.ones((out_size, 1), jnp.float32)
    if out_size == 1:
        pos = jnp.zeros((1,), jnp.float32)
    else:
        pos = jnp.arange(out_size, dtype=jnp.float32) * ((in_size - 1) / (out_size - 1))
    i0 = jnp.clip(jnp.floor(pos), 0, in_size - 2).astype(jnp.int32)
    frac = pos - i0.astype(jnp.float32)
    return (jax.nn.one_hot(i0, in_size, dtype=jnp.float32) * (1.0 - frac)[:, None]
            + jax.nn.one_hot(i0 + 1, in_size, dtype=jnp.float32) * frac[:, None])


# ----------------------------------------------------------------------------------
# Kernel 1: tiled fused matmul  y = relu?((x @ w) * scale + shift)
# ----------------------------------------------------------------------------------
def _matmul_affine_kernel(x_ref, w_ref, s_ref, b_ref, o_ref, acc_ref, *, relu):
    @pl.when(pl.program_id(2) == 0)
    def _():
        acc_ref[...] = jnp.zeros_like(acc_ref)

    acc_ref[...] += jnp.dot(x_ref[...], w_ref[...], preferred_element_type=jnp.float32)

    @pl.when(pl.program_id(2) == pl.num_programs(2) - 1)
    def _():
        y = acc_ref[...] * s_ref[...] + b_ref[...]
        if relu:
            y = jnp.maximum(y, 0.0)
        o_ref[...] = y.astype(o_ref.dtype)


def fused_matmul_affine(x, w, scale, shift, *, relu, out_dtype=jnp.float32,
                        tm_max=256, tn_max=256, tk_max=512):
    """(M, K) @ (K, Cout) + per-channel affine (+ReLU); bf16 MXU, f32 accum.

    Tile caps fit the 32 MiB scoped VMEM on every generation; on v5e/v6e you can raise
    tk_max to 1024-2048 together with _VMEM_LIMIT for fewer reduction steps.
    """
    M, K = x.shape
    Cout = w.shape[1]
    Mp, tm = _pick_tile(M, tm_max, 16)        # bf16 sublane packing -> mult 16
    Np, tn = _pick_tile(Cout, tn_max, 128)
    Kp, tk = _pick_tile(K, tk_max, 128)

    xp = jnp.pad(x.astype(jnp.bfloat16), ((0, Mp - M), (0, Kp - K)))
    wp = jnp.pad(w.astype(jnp.bfloat16), ((0, Kp - K), (0, Np - Cout)))
    sp = jnp.pad(scale.reshape(1, -1).astype(jnp.float32), ((0, 0), (0, Np - Cout)),
                 constant_values=1.0)
    bp = jnp.pad(shift.reshape(1, -1).astype(jnp.float32), ((0, 0), (0, Np - Cout)))

    out = pl.pallas_call(
        functools.partial(_matmul_affine_kernel, relu=relu),
        grid=(Mp // tm, Np // tn, Kp // tk),
        in_specs=[
            pl.BlockSpec((tm, tk), lambda i, j, k: (i, k)),
            pl.BlockSpec((tk, tn), lambda i, j, k: (k, j)),
            pl.BlockSpec((1, tn), lambda i, j, k: (0, j)),
            pl.BlockSpec((1, tn), lambda i, j, k: (0, j)),
        ],
        out_specs=pl.BlockSpec((tm, tn), lambda i, j, k: (i, j)),
        out_shape=jax.ShapeDtypeStruct((Mp, Np), out_dtype),
        scratch_shapes=[pltpu.VMEM((tm, tn), jnp.float32)],
        compiler_params=pltpu.CompilerParams(
            dimension_semantics=("parallel", "parallel", "arbitrary"),
            vmem_limit_bytes=_VMEM_LIMIT),
    )(xp, wp, sp, bp)
    return out[:M, :Cout]


# ----------------------------------------------------------------------------------
# Kernel 2: fused PPM branch (1x1 conv + BN + ReLU + bilinear upsample), grouped over bins
# ----------------------------------------------------------------------------------
def _ppm_branch_kernel(x_ref, w_ref, s_ref, b_ref, a_ref, o_ref):
    # 1x1 conv + BN + ReLU on the pooled rows (bbp rows, Kp lanes in, Crp lanes out)
    y = jnp.dot(x_ref[0, 0], w_ref[0], preferred_element_type=jnp.float32)   # (bbp, Crp)
    y = jnp.maximum(y * s_ref[0] + b_ref[0], 0.0)
    # bilinear upsample to Hf*Wf via the kron(A_h, A_w) matrix; channels-last (Crp lanes)
    o_ref[0, 0] = jnp.dot(a_ref[0], y, preferred_element_type=jnp.float32).astype(o_ref.dtype)


def ppm_branch_fused(xg, wg, sg, bg, ag):
    """xg:(G,N,bbp,Kp) bf16, wg:(G,Kp,Crp) bf16, sg/bg:(G,1,Crp) f32, ag:(G,HWp,bbp) f32
       -> (G, N, HWp, Crp) bf16 (upsampled, channels-last)."""
    G, N, bbp, Kp = xg.shape
    Crp = wg.shape[-1]
    HWp = ag.shape[1]
    return pl.pallas_call(
        _ppm_branch_kernel,
        grid=(G, N),
        in_specs=[
            pl.BlockSpec((1, 1, bbp, Kp), lambda g, n: (g, n, 0, 0)),
            pl.BlockSpec((1, Kp, Crp), lambda g, n: (g, 0, 0)),
            pl.BlockSpec((1, 1, Crp), lambda g, n: (g, 0, 0)),
            pl.BlockSpec((1, 1, Crp), lambda g, n: (g, 0, 0)),
            pl.BlockSpec((1, HWp, bbp), lambda g, n: (g, 0, 0)),
        ],
        out_specs=pl.BlockSpec((1, 1, HWp, Crp), lambda g, n: (g, n, 0, 0)),
        out_shape=jax.ShapeDtypeStruct((G, N, HWp, Crp), jnp.bfloat16),
        compiler_params=pltpu.CompilerParams(
            dimension_semantics=("parallel", "parallel"),
            vmem_limit_bytes=_VMEM_LIMIT),
    )(xg, wg, sg, bg, ag)


# ----------------------------------------------------------------------------------
# Kernel 3: 3x3 conv + BN + ReLU, flat-spatial formulation, Cin-tiled reduction
# ----------------------------------------------------------------------------------
def _conv3x3_kernel(x_ref, w_ref, s_ref, b_ref, o_ref, acc_ref, *, wp2):
    @pl.when(pl.program_id(2) == 0)
    def _():
        acc_ref[...] = jnp.zeros_like(acc_ref)

    mout = o_ref.shape[1]
    for kh in range(3):
        for kw in range(3):
            off = kh * wp2 + kw                          # static flat offset of this tap
            lhs = x_ref[0, off:off + mout, :]            # (Mout, tk) window straight off the ref
            acc_ref[...] += jnp.dot(lhs, w_ref[kh, kw], preferred_element_type=jnp.float32)

    @pl.when(pl.program_id(2) == pl.num_programs(2) - 1)
    def _():
        y = acc_ref[...] * s_ref[...] + b_ref[...]
        o_ref[0] = jnp.maximum(y, 0.0).astype(o_ref.dtype)


def conv3x3_bn_relu(x_nhwc, w4d, scale, shift, *, tn_max=256, tk_max=512):
    """x:(N,Hf,Wf,Cin), w:(3,3,Cin,Cout) -> (N,Hf,Wf,Cout_pad) bf16 (padded channels are 0).

    The padded map is flattened to ((Hf+2)*(Wf+2), Cin) per image; every tap (kh,kw) is then a
    uniform flat shift kh*(Wf+2)+kw, so all Hf*(Wf+2) output positions are computed with one
    big-M dot per tap.  Garbage only lands in the two padding columns, which are sliced off.
    On v7x at production sizes (Cin=4096, Cout=512) drop tn_max to 128 to stay in scoped VMEM.
    """
    N, Hf, Wf, Cin = x_nhwc.shape
    Cout = w4d.shape[-1]
    Cin_p, tk = _pick_tile(Cin, tk_max, 128)
    Cout_p, tn = _pick_tile(Cout, tn_max, 128)
    Wp2 = Wf + 2
    Mout = Hf * Wp2
    L = (Hf + 2) * Wp2 + 2          # +2 so the largest tap window stays in bounds

    xp = jnp.pad(x_nhwc.astype(jnp.bfloat16),
                 ((0, 0), (1, 1), (1, 1), (0, Cin_p - Cin)))        # zero halo + channel pad
    xflat = xp.reshape(N, (Hf + 2) * Wp2, Cin_p)
    xflat = jnp.pad(xflat, ((0, 0), (0, L - (Hf + 2) * Wp2), (0, 0)))
    wp = jnp.pad(w4d.astype(jnp.bfloat16),
                 ((0, 0), (0, 0), (0, Cin_p - Cin), (0, Cout_p - Cout)))
    sp = jnp.pad(scale.reshape(1, -1).astype(jnp.float32), ((0, 0), (0, Cout_p - Cout)),
                 constant_values=1.0)
    bp = jnp.pad(shift.reshape(1, -1).astype(jnp.float32), ((0, 0), (0, Cout_p - Cout)))

    out = pl.pallas_call(
        functools.partial(_conv3x3_kernel, wp2=Wp2),
        grid=(N, Cout_p // tn, Cin_p // tk),
        in_specs=[
            pl.BlockSpec((1, L, tk), lambda n, j, k: (n, 0, k)),
            pl.BlockSpec((3, 3, tk, tn), lambda n, j, k: (0, 0, k, j)),
            pl.BlockSpec((1, tn), lambda n, j, k: (0, j)),
            pl.BlockSpec((1, tn), lambda n, j, k: (0, j)),
        ],
        out_specs=pl.BlockSpec((1, Mout, tn), lambda n, j, k: (n, 0, j)),
        out_shape=jax.ShapeDtypeStruct((N, Mout, Cout_p), jnp.bfloat16),
        scratch_shapes=[pltpu.VMEM((Mout, tn), jnp.float32)],
        compiler_params=pltpu.CompilerParams(
            dimension_semantics=("parallel", "parallel", "arbitrary"),
            vmem_limit_bytes=_VMEM_LIMIT),
    )(xflat, wp, sp, bp)

    # (N, Hf, Wf+2, Cout_p): the last two width columns hold tap-shift garbage -> slice off.
    return out.reshape(N, Hf, Wp2, Cout_p)[:, :, :Wf, :]


# ----------------------------------------------------------------------------------
# Kernel 4: bilinear plane resize (align_corners=True) for the final logits upsample
# ----------------------------------------------------------------------------------
def _resize_kernel(ah_ref, awt_ref, x_ref, o_ref, *, tp, hin):
    # W pass: one 2-D dot with M = tp*Hin (planes already collapsed in the wrapper)
    t = jnp.dot(x_ref[0], awt_ref[...], preferred_element_type=jnp.float32)   # (tp*hin, out_w)
    ah = ah_ref[...]                                                          # (out_h, hin)
    for p in range(tp):                                                       # H pass, per plane
        o_ref[0, p] = jnp.dot(ah, t[p * hin:(p + 1) * hin, :],
                              preferred_element_type=jnp.float32).astype(o_ref.dtype)


def bilinear_resize_planes(planes, out_h, out_w, *, tp_max=32):
    """planes:(P,Hin,Win) f32 -> (P,out_h,out_w) f32, bilinear align_corners=True."""
    P, Hin, Win = planes.shape
    tp = min(tp_max, _round_up(P, 8))
    Pp = _round_up(P, tp)
    Hin_p = _round_up(Hin, 8)
    Win_p = _round_up(Win, 8)
    xp = jnp.pad(planes.astype(jnp.float32),
                 ((0, Pp - P), (0, Hin_p - Hin), (0, Win_p - Win)))
    xb = xp.reshape(Pp // tp, tp * Hin_p, Win_p)                 # collapse planes into rows (XLA)
    A_h = jnp.pad(_interp_matrix(out_h, Hin), ((0, 0), (0, Hin_p - Hin)))       # (out_h, Hin_p)
    A_wT = jnp.pad(_interp_matrix(out_w, Win), ((0, 0), (0, Win_p - Win))).T    # (Win_p, out_w)

    nblk = Pp // tp
    out = pl.pallas_call(
        functools.partial(_resize_kernel, tp=tp, hin=Hin_p),
        grid=(nblk,),
        in_specs=[
            pl.BlockSpec((out_h, Hin_p), lambda p: (0, 0)),
            pl.BlockSpec((Win_p, out_w), lambda p: (0, 0)),
            pl.BlockSpec((1, tp * Hin_p, Win_p), lambda p: (p, 0, 0)),
        ],
        out_specs=pl.BlockSpec((1, tp, out_h, out_w), lambda p: (p, 0, 0, 0)),
        out_shape=jax.ShapeDtypeStruct((nblk, tp, out_h, out_w), jnp.float32),
        compiler_params=pltpu.CompilerParams(
            dimension_semantics=("parallel",),
            vmem_limit_bytes=_VMEM_LIMIT),
    )(A_h, A_wT, xb)
    return out.reshape(Pp, out_h, out_w)[:P]


# ----------------------------------------------------------------------------------
# Parameter construction (deterministic, eval-mode BN folded into scale/shift)
# ----------------------------------------------------------------------------------
def _bn_affine(gamma, beta, mean, var, eps=1e-5):
    scale = gamma / jnp.sqrt(var + eps)
    shift = beta - mean * scale
    return scale, shift


def init_params(key, fea_dim, bins, classes):
    red = fea_dim // len(bins)            # PPM reduction_dim
    down = fea_dim // 4                   # down_dim
    cat_dim = 2 * fea_dim                 # after PPM concat
    params = {"ppm": [], "bins": tuple(bins)}
    keys = jax.random.split(key, 4 * len(bins) + 8)
    ki = 0

    for _ in bins:
        w = 0.1 * jax.random.normal(keys[ki], (red, fea_dim)); ki += 1        # Conv2d 1x1, no bias
        gamma = 1.0 + 0.1 * jax.random.normal(keys[ki], (red,)); ki += 1
        beta = 0.1 * jax.random.normal(keys[ki], (red,)); ki += 1
        stats = jax.random.normal(keys[ki], (2, red)); ki += 1
        mean, var = 0.1 * stats[0], 1.0 + 0.1 * jnp.abs(stats[1])
        scale, shift = _bn_affine(gamma, beta, mean, var)
        params["ppm"].append({"w": w.T, "scale": scale, "shift": shift})      # (fea_dim, red)

    # cls[0]: Conv2d(cat_dim, down, k=3, pad=1, bias=False) + BN + ReLU
    w1 = 0.1 * jax.random.normal(keys[ki], (down, cat_dim, 3, 3)); ki += 1
    gamma = 1.0 + 0.1 * jax.random.normal(keys[ki], (down,)); ki += 1
    beta = 0.1 * jax.random.normal(keys[ki], (down,)); ki += 1
    stats = jax.random.normal(keys[ki], (2, down)); ki += 1
    mean, var = 0.1 * stats[0], 1.0 + 0.1 * jnp.abs(stats[1])
    scale1, shift1 = _bn_affine(gamma, beta, mean, var)
    params["cls1"] = {"w": jnp.transpose(w1, (2, 3, 1, 0)),                   # (kh, kw, cin, cout)
                      "scale": scale1, "shift": shift1}

    # cls[4]: Conv2d(down, classes, k=1, bias=True)
    w2 = 0.1 * jax.random.normal(keys[ki], (classes, down)); ki += 1
    b2 = 0.1 * jax.random.normal(keys[ki], (classes,)); ki += 1
    params["cls2"] = {"w": w2.T, "scale": jnp.ones((classes,)), "shift": b2}
    return params


# ----------------------------------------------------------------------------------
# PPM_Net head forward
# ----------------------------------------------------------------------------------
def ppm_net_forward(x_feat_nchw, params, out_hw):
    """x_feat_nchw: (N, fea_dim, Hf, Wf) layer4 feature map.  Returns (N, classes, h, w)."""
    h, w = out_hw
    N, C, Hf, Wf = x_feat_nchw.shape
    bins = params["bins"]
    G = len(bins)
    x_nhwc = jnp.transpose(x_feat_nchw, (0, 2, 3, 1)).astype(jnp.float32)     # NHWC

    # ---- PPM: exact adaptive pools (XLA glue) + ONE fused conv/BN/ReLU/upsample kernel ----
    red = params["ppm"][0]["w"].shape[1]
    Kp = _round_up(C, 128)
    Crp = _round_up(red, 128)
    bbp = _round_up(max(bins) ** 2, 16)
    HW = Hf * Wf
    HWp = _round_up(HW, 16)

    xg, wg, sg, bg, ag = [], [], [], [], []
    for b, p in zip(bins, params["ppm"]):
        Ph = _adaptive_pool_matrix(b, Hf)                                     # exact AdaptiveAvgPool2d
        Pw = _adaptive_pool_matrix(b, Wf)
        pooled = jnp.einsum("ih,nhwc->niwc", Ph, x_nhwc)
        pooled = jnp.einsum("jw,niwc->nijc", Pw, pooled)                      # (N, b, b, C)
        rows = pooled.reshape(N, b * b, C)
        xg.append(jnp.pad(rows, ((0, 0), (0, bbp - b * b), (0, Kp - C))))
        wg.append(jnp.pad(p["w"], ((0, Kp - C), (0, Crp - red))))
        sg.append(jnp.pad(p["scale"].reshape(1, -1), ((0, 0), (0, Crp - red)),
                          constant_values=1.0))
        bg.append(jnp.pad(p["shift"].reshape(1, -1), ((0, 0), (0, Crp - red))))
        # kron of the two 1-D bilinear (align_corners=True) matrices: (Hf*Wf, b*b)
        Ah = _interp_matrix(Hf, b)
        Aw = _interp_matrix(Wf, b)
        A2 = jnp.einsum("hi,wj->hwij", Ah, Aw).reshape(HW, b * b)
        ag.append(jnp.pad(A2, ((0, HWp - HW), (0, bbp - b * b))))

    ppm_out = ppm_branch_fused(jnp.stack(xg).astype(jnp.bfloat16),
                               jnp.stack(wg).astype(jnp.bfloat16),
                               jnp.stack(sg).astype(jnp.float32),
                               jnp.stack(bg).astype(jnp.float32),
                               jnp.stack(ag).astype(jnp.float32))             # (G, N, HWp, Crp)

    ppm_feats = ppm_out[:, :, :HW, :red]                                      # (G, N, HW, red)
    ppm_feats = jnp.transpose(ppm_feats, (1, 2, 0, 3)).reshape(N, Hf, Wf, G * red)
    x_cat = jnp.concatenate([x_nhwc.astype(jnp.bfloat16), ppm_feats], axis=-1)  # (N,Hf,Wf,2C)

    # ---- cls: 3x3 conv + BN + ReLU (flat-spatial, Cin-tiled reduction) ----
    y1 = conv3x3_bn_relu(x_cat, params["cls1"]["w"],
                         params["cls1"]["scale"], params["cls1"]["shift"])    # (N,Hf,Wf,down_pad)
    # Dropout2d(p=0.1) in eval mode == identity.
    down = params["cls1"]["w"].shape[-1]
    down_pad = y1.shape[-1]

    # ---- cls: 1x1 conv (+bias) via the tiled fused matmul kernel ----
    classes = params["cls2"]["w"].shape[1]
    w2 = jnp.pad(params["cls2"]["w"], ((0, down_pad - down), (0, 0)))         # zero-padded K rows
    y2 = fused_matmul_affine(y1.reshape(N * Hf * Wf, down_pad), w2,
                             params["cls2"]["scale"], params["cls2"]["shift"],
                             relu=False, out_dtype=jnp.float32)               # (N*Hf*Wf, classes)

    # ---- final bilinear upsample, computed in NCHW plane layout (== output layout) ----
    planes = jnp.transpose(y2.reshape(N, Hf, Wf, classes), (0, 3, 1, 2)).reshape(N * classes, Hf, Wf)
    out = bilinear_resize_planes(planes, h, w)                                # (N*classes, h, w)
    return out.reshape(N, classes, h, w)


# ----------------------------------------------------------------------------------
if __name__ == "__main__":
    N, fea_dim, Hf, Wf = 2, 16, 12, 12
    bins = (1, 2, 3, 6)
    classes = 2
    out_hw = (48, 48)   # original image (h, w) that the final bilinear upsample targets

    key = jax.random.PRNGKey(0)
    k_x, k_p = jax.random.split(key)
    x_feat = jax.random.normal(k_x, (N, fea_dim, Hf, Wf), dtype=jnp.float32)
    params = init_params(k_p, fea_dim, bins, classes)

    out = ppm_net_forward(x_feat, params, out_hw)
    out = jax.block_until_ready(out)
    assert out.shape == (N, classes, out_hw[0], out_hw[1])
    assert bool(jnp.all(jnp.isfinite(out)))
    print("KERNEL_OK")
</pallas_src>

<mosaic_0001>
module attributes {stable_mosaic.version = 11 : i64} {
  func.func @_ppm_branch_kernel(%arg0: i32, %arg1: i32, %arg2: memref<1x1x48x128xbf16, #tpu.memory_space<vmem>>, %arg3: memref<1x128x128xbf16, #tpu.memory_space<vmem>>, %arg4: memref<1x1x128xf32, #tpu.memory_space<vmem>>, %arg5: memref<1x1x128xf32, #tpu.memory_space<vmem>>, %arg6: memref<1x144x48xf32, #tpu.memory_space<vmem>>, %arg7: memref<1x1x144x128xbf16, #tpu.memory_space<vmem>>) attributes {dimension_semantics = [#tpu.dimension_semantics<parallel>, #tpu.dimension_semantics<parallel>], iteration_bounds = array<i64: 4, 2>, scalar_prefetch = 0 : i64, scratch_operands = 0 : i64, tpu.core_type = #tpu.core_type<tc>, window_params = [{transform_indices = @transform_0, window_bounds = array<i64: 1, 1, 48, 128>}, {transform_indices = @transform_1, window_bounds = array<i64: 1, 128, 128>}, {transform_indices = @transform_2, window_bounds = array<i64: 1, 1, 128>}, {transform_indices = @transform_3, window_bounds = array<i64: 1, 1, 128>}, {transform_indices = @transform_4, window_bounds = array<i64: 1, 144, 48>}, {transform_indices = @transform_5, window_bounds = array<i64: 1, 1, 144, 128>}]} {
    %c0 = arith.constant 0 : index
    %c0_0 = arith.constant 0 : index
    %c0_1 = arith.constant 0 : index
    %c0_2 = arith.constant 0 : index
    %0 = vector.load %arg2[%c0, %c0_0, %c0_1, %c0_2] : memref<1x1x48x128xbf16, #tpu.memory_space<vmem>>, vector<1x1x48x128xbf16>
    %1 = vector.shape_cast %0 : vector<1x1x48x128xbf16> to vector<48x128xbf16>
    %c0_3 = arith.constant 0 : index
    %c0_4 = arith.constant 0 : index
    %c0_5 = arith.constant 0 : index
    %2 = vector.load %arg3[%c0_3, %c0_4, %c0_5] : memref<1x128x128xbf16, #tpu.memory_space<vmem>>, vector<1x128x128xbf16>
    %3 = vector.shape_cast %2 : vector<1x128x128xbf16> to vector<128x128xbf16>
    %cst = arith.constant dense<0.000000e+00> : vector<48x128xf32>
    %4 = tpu.matmul %1, %3, %cst {dimension_numbers = #tpu.dot_dimension_numbers<[1], [0], [0], [1], [0, 0, 1, 1], [], []>} : vector<48x128xbf16>, vector<128x128xbf16>, vector<48x128xf32> -> vector<48x128xf32>
    %c0_6 = arith.constant 0 : index
    %c0_7 = arith.constant 0 : index
    %c0_8 = arith.constant 0 : index
    %5 = vector.load %arg4[%c0_6, %c0_7, %c0_8] : memref<1x1x128xf32, #tpu.memory_space<vmem>>, vector<1x1x128xf32>
    %6 = vector.shape_cast %5 : vector<1x1x128xf32> to vector<1x128xf32>
    %7 = vector.broadcast %6 : vector<1x128xf32> to vector<48x128xf32>
    %8 = arith.mulf %4, %7 : vector<48x128xf32>
    %c0_9 = arith.constant 0 : index
    %c0_10 = arith.constant 0 : index
    %c0_11 = arith.constant 0 : index
    %9 = vector.load %arg5[%c0_9, %c0_10, %c0_11] : memref<1x1x128xf32, #tpu.memory_space<vmem>>, vector<1x1x128xf32>
    %10 = vector.shape_cast %9 : vector<1x1x128xf32> to vector<1x128xf32>
    %11 = vector.broadcast %10 : vector<1x128xf32> to vector<48x128xf32>
    %12 = arith.addf %8, %11 : vector<48x128xf32>
    %cst_12 = arith.constant 0.000000e+00 : f32
    %13 = vector.broadcast %cst_12 : f32 to vector<48x128xf32>
    %14 = arith.maximumf %12, %13 : vector<48x128xf32>
    %c0_13 = arith.constant 0 : index
    %c0_14 = arith.constant 0 : index
    %c0_15 = arith.constant 0 : index
    %15 = vector.load %arg6[%c0_13, %c0_14, %c0_15] : memref<1x144x48xf32, #tpu.memory_space<vmem>>, vector<1x144x48xf32>
    %16 = vector.shape_cast %15 : vector<1x144x48xf32> to vector<144x48xf32>
    %cst_16 = arith.constant dense<0.000000e+00> : vector<144x128xf32>
    %17 = tpu.matmul %16, %14, %cst_16 {dimension_numbers = #tpu.dot_dimension_numbers<[1], [0], [0], [1], [0, 0, 1, 1], [], []>} : vector<144x48xf32>, vector<48x128xf32>, vector<144x128xf32> -> vector<144x128xf32>
    %18 = arith.truncf %17 : vector<144x128xf32> to vector<144x128xbf16>
    %c0_17 = arith.constant 0 : index
    %c0_18 = arith.constant 0 : index
    %c0_19 = arith.constant 0 : index
    %c0_20 = arith.constant 0 : index
    %19 = vector.load %arg7[%c0_17, %c0_18, %c0_19, %c0_20] : memref<1x1x144x128xbf16, #tpu.memory_space<vmem>>, vector<1x1x144x128xbf16>
    %20 = vector.shape_cast %19 : vector<1x1x144x128xbf16> to vector<144x128xbf16>
    %21 = vector.shape_cast %18 : vector<144x128xbf16> to vector<1x1x144x128xbf16>
    tpu.vector_store %arg7[%c0_17, %c0_18, %c0_19, %c0_20], %21 {strides = array<i32>} : memref<1x1x144x128xbf16, #tpu.memory_space<vmem>>, vector<1x1x144x128xbf16>,
    return
  }
  func.func @transform_0(%arg0: i32, %arg1: i32) -> (i32, i32, i32, i32) {
    %c0_i32 = arith.constant 0 : i32
    %c0_i32_0 = arith.constant 0 : i32
    %c0_i32_1 = arith.constant 0 : i32
    return %arg0, %arg1, %c0_i32, %c0_i32_0 : i32, i32, i32, i32
  }
  func.func @transform_1(%arg0: i32, %arg1: i32) -> (i32, i32, i32) {
    %c0_i32 = arith.constant 0 : i32
    %c0_i32_0 = arith.constant 0 : i32
    %c0_i32_1 = arith.constant 0 : i32
    return %arg0, %c0_i32, %c0_i32_0 : i32, i32, i32
  }
  func.func @transform_2(%arg0: i32, %arg1: i32) -> (i32, i32, i32) {
    %c0_i32 = arith.constant 0 : i32
    %c0_i32_0 = arith.constant 0 : i32
    %c0_i32_1 = arith.constant 0 : i32
    return %arg0, %c0_i32, %c0_i32_0 : i32, i32, i32
  }
  func.func @transform_3(%arg0: i32, %arg1: i32) -> (i32, i32, i32) {
    %c0_i32 = arith.constant 0 : i32
    %c0_i32_0 = arith.constant 0 : i32
    %c0_i32_1 = arith.constant 0 : i32
    return %arg0, %c0_i32, %c0_i32_0 : i32, i32, i32
  }
  func.func @transform_4(%arg0: i32, %arg1: i32) -> (i32, i32, i32) {
    %c0_i32 = arith.constant 0 : i32
    %c0_i32_0 = arith.constant 0 : i32
    %c0_i32_1 = arith.constant 0 : i32
    return %arg0, %c0_i32, %c0_i32_0 : i32, i32, i32
  }
  func.func @transform_5(%arg0: i32, %arg1: i32) -> (i32, i32, i32, i32) {
    %c0_i32 = arith.constant 0 : i32
    %c0_i32_0 = arith.constant 0 : i32
    %c0_i32_1 = arith.constant 0 : i32
    return %arg0, %arg1, %c0_i32, %c0_i32_0 : i32, i32, i32, i32
  }
}

</mosaic_0001>

<bundles_post_ra>
// kernel: tpu_custom_call.1
= control target key start
LH: loop header
LB: loop body
LE: loop exit
PB: predicated region body
PF: predicated region fallthrough
CT: control target
= control target key end

     0   :  { %10 = vsyncpa [#allocation3], 0  ;;  %s1347_s0 = inlined_call_operand.vmem [shape: bf16[4,2,48,128], index: 0, kind: input, shape index: {}]   ;;  %s1348_s1 = inlined_call_operand.vmem [shape: bf16[4,128,128], index: 1, kind: input, shape index: {}]   ;;  %s1349_s2 = inlined_call_operand.vmem [shape: f32[4,1,128], index: 2, kind: input, shape index: {}]   ;;  %s1350_s3 = inlined_call_operand.vmem [shape: f32[4,1,128], index: 3, kind: input, shape index: {}]   ;;  %s1351_s4 = inlined_call_operand.vmem [shape: f32[4,144,48], index: 4, kind: input, shape index: {}]   ;;  %s1352_s5 = inlined_call_operand.hbm [shape: bf16[4,2,144,128], index: 5, kind: output, shape index: {}]  }
   0x1   :  { %12 = vsyncpa [#allocation3 + $0x1], 0  ;;  %s1142_s18 = smov 0   ;;  %s1144_s19 = smov 0  }
   0x2   :  { %s1146_s20 = smov 0   ;;  %s1148_s21 = smov 0  }
   0x3   :  { %s1150_s22 = smov 0   ;;  %s1152_s23 = smov 0  }
   0x4   :  { %s1154_s24 = smov 0   ;;  %s1156_s25 = smov 0  }
   0x5 LB: > { %s782_s26 = sadd.s32 4294967295, %s1108_s25   ;;  %s783_s27 = sadd.s32 4294967294, %s1108_s25   ;;  %s1108_s25 = sphi %s1156_s25, %s18_s25   ;;  %s1104_s24 = sphi %s1154_s24, %s1361_s24   ;;  %s1100_s23 = sphi %s1152_s23, %s1360_s23   ;;  %s1096_s22 = sphi %s1150_s22, %s1359_s22   ;;  %s1092_s21 = sphi %s1148_s21, %s1358_s21   ;;  %s1088_s20 = sphi %s1146_s20, %s1357_s20   ;;  %s1084_s19 = sphi %s1144_s19, %s1356_s19   ;;  %s1080_s18 = sphi %s1142_s18, %s1355_s18  }
   0x6   : > { %s27_s28 = sadd.s32 1, %s1100_s23  ;;  %s30_s29 = sadd.s32 1, %s1104_s24 }
   0x7   : > { %p28_p0 = scmp.ge.s32.totalorder %s27_s28, 2  ;;  %p181_p1 = scmp.ne.s32.totalorder %s1088_s20, %s1084_s19 }
   0x8   : > { %p182_p2 = scmp.eq.s32.totalorder %s782_s26, 7  ;;  %p187_p5 = scmp.ne.s32.totalorder %s1084_s19, %s1080_s18 }
   0x9   : > { %s1363_s28 = smov (%p28_p0, %s27_s28), 0  ;;  %s1365_s29 = smov (!%p28_p0, %s30_s29), %s1104_s24 }
   0xa   : > { %s167_s30 = ssub.s32 %s1100_s23, %s1363_s28  ;;  %p1193_p3 = por %p182_p2, %p181_p1 }
   0xb   : > { %p32_p4 = scmp.ge.s32.totalorder %s1365_s29, 4  ;;  %p188_p6 = scmp.eq.s32.totalorder %s783_s27, 7 }
   0xc   : > { %p786_p7 = scmp.ge.s32.totalorder %s1108_s25, 1  ;;  %p246_p9 = scmp.lt.s32.totalorder %s1108_s25, 9 }
   0xd   : > { %s1367_s29 = smov (%p32_p4, %s1365_s29), 0  ;;  %p1202_p8 = por %p188_p6, %p187_p5 }
   0xe   : > { %s166_s8 = ssub.s32 %s1104_s24, %s1367_s29  ;;  %s171_s9 = sadd.s32 1, %s1088_s20 }
   0xf   : > { %s168_s10 = sor.u32 %s167_s30, %s166_s8  ;;  %p247_p10 = pnand %p786_p7, %p246_p9 }
  0x10   : > { %p169_p11 = scmp.eq.s32.totalorder %s168_s10, 0  ;;  %p294_p12 = scmp.lt.s32.totalorder (!%p247_p10), %s1096_s22, 3 }
  0x11   : > { %250 = sbr.rel (%p247_p10) target bundleno = 428 (0x1ac), region = 40  ;;  %p296_p13 = scmp.lt.s32.totalorder (!%p247_p10), %s1092_s21, 1 }
  0x12   : > { %s1211_s11 = scalar_select %p169_p11, %s1088_s20, %s171_s9  }
  0x16   : > { %s1215_s12 = scalar_select %p294_p12, %s1096_s22, 3  ;;  %vm475_vm0 = vcmask 392192  }
  0x17   : > { %s297_s10 = scalar_select %p296_p13, %s1092_s21, 1 }
  0x18   : > { %s856_s13 = sshll.u32 %s1215_s12, 6  ;;  %s310_s27 = scalar_lea.vmem %s1349_s2, %s1215_s12 }
  0x19   : > { %s307_s16 = scalar_lea.vmem %s1348_s1, %s856_s13  ;;  %s313_s9 = scalar_lea.vmem %s1350_s3, %s1215_s12  ;;  %v1012_v16 = vld [vmem:[%s310_s27] ss:$0 sm:$0xff] }
  0x1a   : > { %v867_v0 = vld [vmem:[%s307_s16 + $0x38] sm:$0xff]  ;;  %v866_v1 = vld [vmem:[%s307_s16 + $0x30] sm:$0xff]  ;;  %v865_v2 = vld [vmem:[%s307_s16 + $0x28] sm:$0xff]  ;;  %s935_s13 = smul.u32 12, %s1215_s12 }
  0x1b   : > { %407 = vmatpush.bf16.msra.mxu0 %v867_v0  ;;  %v864_v3 = vld [vmem:[%s307_s16 + $0x20] sm:$0xff]  ;;  %v863_v4 = vld [vmem:[%s307_s16 + $0x18] sm:$0xff]  ;;  %s934_s14 = smul.u32 6, %s297_s10  ;;  %v862_v5 = vld [vmem:[%s307_s16 + $0x10] sm:$0xff] }
  0x1c   : > { %v861_v6 = vld [vmem:[%s307_s16 + $0x8] sm:$0xff]  ;;  %v860_v7 = vld [vmem:[%s307_s16] sm:$0xff]  ;;  %s936_s27 = smul.u32 144, %s1215_s12  ;;  %s291_s12 = sand.u32 1, %s1084_s19  }
  0x1d   : > { %s300_s15 = sadd.s32 %s935_s13, %s934_s14  ;;  %v1013_v19 = vld [vmem:[%s313_s9] ss:$0 sm:$0xff]  ;;  %s933_s26 = smul.u32 72, %s291_s12 }
  0x1e   : > { %s787_s17 = sshll.u32 %s300_s15, 2  ;;  %s938_s10 = smul.u32 36, %s1096_s22 }
  0x1f   : > { %408 = vmatpush.bf16.msra.mxu0 %v866_v1  ;;  %s302_s8 = scalar_lea.vmem %s1347_s0, %s787_s17  ;;  %s1249_s17 = scalar_lea.vmem %s1351_s4, %s936_s27 }
  0x20   : > { %v857_v8 = vld [vmem:[%s302_s8] sm:$0xff]  ;;  %v858_v9 = vld [vmem:[%s302_s8 + $0x8] sm:$0xff]  ;;  %v859_v10 = vld [vmem:[%s302_s8 + $0x10] sm:$0xff]  ;;  %s1290_s30 = scalar_lea.vmem [#allocation2], %s933_s26  ;;  %s937_s8 = smul.u32 18, %s1092_s21 }
  0x21   : > { %v457_v37 = vld [vmem:[%s1249_s17] sm:$0xff]  ;;  %v464_v38 = vld [vmem:[%s1249_s17 + $0x38] sm:$0xff]  ;;  %v471_v39 = vld [vmem:[%s1249_s17 + $0x70] sm:$0xff]  ;;  %s652_s21 = sshll.u32 %s1290_s30, 4  ;;  %s638_s15 = scalar_lea.sflag [#allocation3], %s291_s12  ;;  %s653_s21 = int_to_ptr.vmem [resolvable:$true] %s652_s21 }
  0x22   : > { %v458_v40 = vld [vmem:[%s1249_s17 + $0x8] sm:$0xff]  ;;  %v465_v41 = vld [vmem:[%s1249_s17 + $0x40] sm:$0xff]  ;;  %v472_v42 = vld [vmem:[%s1249_s17 + $0x78] sm:$0xff]  ;;  %s649_s13 = sadd.s32 %s938_s10, %s937_s8 }
  0x23   : > { %409 = vmatpush.bf16.msra.mxu0 %v865_v2  ;;  %v459_v43 = vld [vmem:[%s1249_s17 + $0x10] sm:$0xff]  ;;  %v466_v44 = vld [vmem:[%s1249_s17 + $0x48] sm:$0xff]  ;;  %v473_v45 = vld [vmem:[%s1249_s17 + $0x80] sm:$0xff]  ;;  %s853_s16 = sshll.u32 %s649_s13, 2  ;;  %s1034_s13 = scalar_lea.hbm %s1352_s5, 576 }
  0x24   : > { %v460_v46 = vld [vmem:[%s1249_s17 + $0x18] sm:$0xff]  ;;  %v467_v47 = vld [vmem:[%s1249_s17 + $0x50] sm:$0xff]  ;;  %v474_v48 = vld [vmem:[%s1249_s17 + $0x88] sm:$0xff]  ;;  %s651_s9 = scalar_lea.hbm %s1352_s5, %s853_s16 }
  0x25   : > { %v461_v49 = vld [vmem:[%s1249_s17 + $0x20] sm:$0xff]  ;;  %v468_v50 = vld [vmem:[%s1249_s17 + $0x58] sm:$0xff]  ;;  %v462_v51 = vld [vmem:[%s1249_s17 + $0x28] sm:$0xff]  ;;  %s654_s22 = sshll.u32 %s651_s9, 4  ;;  %s655_s22 = int_to_ptr.hbm [resolvable:$true] %s654_s22 }
  0x26   : > { %v469_v52 = vld [vmem:[%s1249_s17 + $0x60] sm:$0xff]  ;;  %v463_v53 = vld [vmem:[%s1249_s17 + $0x30] sm:$0xff]  ;;  %v470_v54 = vld [vmem:[%s1249_s17 + $0x68] sm:$0xff]  ;;  %s1028_s17 = sshra.s32 %s655_s22, 4  ;;  %s1029_s17 = int_to_ptr.hbm [resolvable:$true] %s1028_s17 }
  0x27   : > { %410 = vmatpush.bf16.msra.mxu0 %v864_v3  ;;  %s1030_s26 = scalar_lea.hbm %s1029_s17, 72  ;;  %p1035_p4 = scmp.lt.s32.totalorder %s1029_s17, %s1352_s5 }
  0x28   : > { %p1031_p0 = scmp.ne.s32.totalorder %s1029_s17, %s1030_s26  ;;  %p1036_p5 = scmp.lt.s32.totalorder %s1034_s13, %s1030_s26 }
  0x2a   : > { %p1032_p1 = pnand %p1031_p0, %p1193_p3  ;;  %p1037_p6 = por %p1036_p5, %p1035_p4 }
  0x2b   : > { %411 = vmatpush.bf16.msra.mxu0 %v863_v4 }
  0x2c   : > { %p1033_p2 = pneg %p1032_p1 }
  0x2e   : > { %p1038_p7 = pnand %p1037_p6, %p1033_p2 }
  0x2f   : > { %412 = vmatpush.bf16.msra.mxu0 %v862_v5 }
  0x33   : > { %413 = vmatpush.bf16.msra.mxu0 %v861_v6 }
  0x37   : > { %414 = vmatpush.bf16.msra.mxu0 %v860_v7 }
  0x3a   : > { %415 = vmatmul.bf16.vlgmr.msra.gmra.mxu0 %v857_v8 }
  0x4a   : > { %420 = vmatmul.bf16.gmra.mxu0 %v858_v9 }
  0x5a   : > { %425 = vmatmul.bf16.gmra.mxu0 %v859_v10 }
  0xb7   : > { %v416_v11 = vpop.f32.mrf.mxu0 }
  0xb8   : > { %v435_v28 = vmul.f32 %v1012_v16, %v416_v11 }
  0xba   : > { %v445_v33 = vadd.f32 %v1013_v19, %v435_v28 }
  0xbc   : > { %v451_v36 = vmax.f32 %v445_v33, 0.0 }
  0xbf   : > { %v418_v12 = vpop.f32.mrf.mxu0 }
  0xc0   : > { %v436_v25 = vmul.f32 %v1012_v16, %v418_v12 }
  0xc2   : > { %v446_v31 = vadd.f32 %v1013_v19, %v436_v25 }
  0xc4   : > { %v452_v35 = vmax.f32 %v446_v31, 0.0 }
  0xc7   : > { %v421_v13 = vpop.f32.mrf.mxu0 }
  0xc8   : > { %v437_v22 = vmul.f32 %v1012_v16, %v421_v13 }
  0xca   : > { %v447_v29 = vadd.f32 %v1013_v19, %v437_v22 }
  0xcc   : > { %v453_v34 = vmax.f32 %v447_v29, 0.0 }
  0xcf   : > { %v423_v14 = vpop.f32.mrf.mxu0 }
  0xd0   : > { %v438_v20 = vmul.f32 %v1012_v16, %v423_v14 }
  0xd2   : > { %v448_v26 = vadd.f32 %v1013_v19, %v438_v20 }
  0xd4   : > { %v454_v32 = vmax.f32 %v448_v26, 0.0 }
  0xd7   : > { %v426_v15 = vpop.f32.mrf.mxu0 }
  0xd8   : > { %v439_v17 = vmul.f32 %v1012_v16, %v426_v15 }
  0xda   : > { %v449_v23 = vadd.f32 %v1013_v19, %v439_v17 }
  0xdc   : > { %v455_v30 = vmax.f32 %v449_v23, 0.0 }
  0xdf   : > { %v428_v18 = vpop.f32.mrf.mxu0 }
  0xe0   : > { %v440_v21 = vmul.f32 %v1012_v16, %v428_v18 }
  0xe2   : > { %v450_v24 = vadd.f32 %v1013_v19, %v440_v21 }
  0xe4   : > { %v456_v27 = vmax.f32 %v450_v24, 0.0 }
  0xe6   : > { %540 = vmatpush.msra.mxu1 %v456_v27  ;;  %921 = vmatpush.msra.mxu2 %v456_v27 }
  0xe7   : > { %922 = vmatpush.msra.mxu3 %v456_v27 }
  0xe8   : > { %541 = vmatpush.msra.mxu1 %v455_v30  ;;  %923 = vmatpush.msra.mxu2 %v455_v30 }
  0xe9   : > { %924 = vmatpush.msra.mxu3 %v455_v30 }
  0xea   : > { %542 = vmatpush.msra.mxu1 %v454_v32  ;;  %925 = vmatpush.msra.mxu2 %v454_v32 }
  0xeb   : > { %926 = vmatpush.msra.mxu3 %v454_v32 }
  0xec   : > { %543 = vmatpush.msra.mxu1 %v453_v34  ;;  %927 = vmatpush.msra.mxu2 %v453_v34 }
  0xed   : > { %928 = vmatpush.msra.mxu3 %v453_v34 }
  0xee   : > { %544 = vmatpush.msra.mxu1 %v452_v35  ;;  %929 = vmatpush.msra.mxu2 %v452_v35 }
  0xef   : > { %930 = vmatpush.msra.mxu3 %v452_v35 }
  0xf0   : > { %545 = vmatpush.msra.mxu1 %v451_v36  ;;  %931 = vmatpush.msra.mxu2 %v451_v36 }
  0xf1   : > { %932 = vmatpush.msra.mxu3 %v451_v36  ;;  %835 = vmatmul.msk.f32.vlgmr.msra.gmra.mxu1 %vm475_vm0, %v457_v37 }
  0xf2   : > { %842 = vmatmul.msk.f32.vlgmr.msra.gmra.mxu2 %vm475_vm0, %v464_v38  ;;  %849 = vmatmul.msk.f32.vlgmr.msra.gmra.mxu3 %vm475_vm0, %v471_v39 }
  0xf9   : > { %836 = vmatmul.msk.f32.gmra.mxu1 %vm475_vm0, %v458_v40 }
  0xfa   : > { %843 = vmatmul.msk.f32.gmra.mxu2 %vm475_vm0, %v465_v41  ;;  %850 = vmatmul.msk.f32.gmra.mxu3 %vm475_vm0, %v472_v42 }
 0x101   : > { %837 = vmatmul.msk.f32.gmra.mxu1 %vm475_vm0, %v459_v43 }
 0x102   : > { %844 = vmatmul.msk.f32.gmra.mxu2 %vm475_vm0, %v466_v44  ;;  %851 = vmatmul.msk.f32.gmra.mxu3 %vm475_vm0, %v473_v45 }
 0x109   : > { %838 = vmatmul.msk.f32.gmra.mxu1 %vm475_vm0, %v460_v46 }
 0x10a   : > { %845 = vmatmul.msk.f32.gmra.mxu2 %vm475_vm0, %v467_v47  ;;  %852 = vmatmul.msk.f32.gmra.mxu3 %vm475_vm0, %v474_v48 }
 0x111   : > { %839 = vmatmul.msk.f32.gmra.mxu1 %vm475_vm0, %v461_v49 }
 0x112   : > { %846 = vmatmul.msk.f32.gmra.mxu2 %vm475_vm0, %v468_v50 }
 0x119   : > { %840 = vmatmul.msk.f32.gmra.mxu1 %vm475_vm0, %v462_v51 }
 0x11a   : > { %847 = vmatmul.msk.f32.gmra.mxu2 %vm475_vm0, %v469_v52 }
 0x121   : > { %841 = vmatmul.msk.f32.gmra.mxu1 %vm475_vm0, %v463_v53 }
 0x122   : > { %848 = vmatmul.msk.f32.gmra.mxu2 %vm475_vm0, %v470_v54 }
 0x16e   : > { %v547_v55 = vpop.f32.mrf.mxu1 }
 0x175   : > { %v568_v56 = vpop.f32.mrf.mxu2  ;;  %v589_v57 = vpop.f32.mrf.mxu3 }
 0x176   : > { %v550_v58 = vpop.f32.mrf.mxu1 }
 0x177   : > { %v871_v59 = vpack.c.bf16 %v550_v58, %v547_v55 }
 0x179   : > { %872 = vst [vmem:[%s1290_s30] sm:$0xff] %v871_v59  }
 0x17d   : > { %v571_v60 = vpop.f32.mrf.mxu2  ;;  %v592_v61 = vpop.f32.mrf.mxu3 }
 0x17e   : > { %v553_v62 = vpop.f32.mrf.mxu1  ;;  %v906_v63 = vpack.c.bf16 %v592_v61, %v589_v57 }
 0x180   : > { %919 = vst [vmem:[%s1290_s30 + $0x38] sm:$0xff] %v906_v63  }
 0x185   : > { %v574_v0 = vpop.f32.mrf.mxu2  ;;  %v595_v1 = vpop.f32.mrf.mxu3 }
 0x186   : > { %v891_v2 = vpack.c.bf16 %v574_v0, %v571_v60  ;;  %v556_v3 = vpop.f32.mrf.mxu1 }
 0x187   : > { %v876_v4 = vpack.c.bf16 %v556_v3, %v553_v62 }
 0x188   : > { %916 = vst [vmem:[%s1290_s30 + $0x20] sm:$0xff] %v891_v2  }
 0x189   : > { %913 = vst [vmem:[%s1290_s30 + $0x8] sm:$0xff] %v876_v4  }
 0x18d   : > { %v577_v5 = vpop.f32.mrf.mxu2  ;;  %v598_v6 = vpop.f32.mrf.mxu3 }
 0x18e   : > { %v559_v7 = vpop.f32.mrf.mxu1  ;;  %v911_v8 = vpack.c.bf16 %v598_v6, %v595_v1 }
 0x190   : > { %920 = vst [vmem:[%s1290_s30 + $0x40] sm:$0xff] %v911_v8  }
 0x195   : > { %v580_v9 = vpop.f32.mrf.mxu2 }
 0x196   : > { %v896_v10 = vpack.c.bf16 %v580_v9, %v577_v5  ;;  %v562_v11 = vpop.f32.mrf.mxu1 }
 0x197   : > { %v881_v12 = vpack.c.bf16 %v562_v11, %v559_v7 }
 0x198   : > { %917 = vst [vmem:[%s1290_s30 + $0x28] sm:$0xff] %v896_v10  }
 0x199   : > { %914 = vst [vmem:[%s1290_s30 + $0x10] sm:$0xff] %v881_v12  }
 0x19d   : > { %v583_v13 = vpop.f32.mrf.mxu2 }
 0x19e   : > { %v565_v14 = vpop.f32.mrf.mxu1 }
 0x19f   : > { %v886_v15 = vpack.c.bf16 %v568_v56, %v565_v14 }
 0x1a1   : > { %915 = vst [vmem:[%s1290_s30 + $0x18] sm:$0xff] %v886_v15  }
 0x1a5   : > { %v586_v16 = vpop.f32.mrf.mxu2 }
 0x1a6   : > { %v901_v17 = vpack.c.bf16 %v586_v16, %v583_v13 }
 0x1a8   : > { %918 = vst [vmem:[%s1290_s30 + $0x30] sm:$0xff] %v901_v17  }
 0x1a9   : > { %1041 = shalt.err (!%p1038_p7)
}
 0x1aa   : > { %s1110_s12 = smov 64   ;;  %s1111_s30 = smov 4  }
 0x1ab   : > { %939 = dma.vmem_to_hbm [thread:$0]  (%p1193_p3), %s653_s21, 1152, %s655_s22, %s638_s15, %s1110_s12, %s1110_s12, %s1111_s30  }
 0x1ac PF: > { %p945_p9 = scmp.ge.s32.totalorder %s1108_s25, 2  ;;  %s669_s27 = sand.u32 1, %s1080_s18  }
 0x1ad   : > { %s670_s9 = scalar_lea.sflag [#allocation3], %s669_s27 }
 0x1ae   : > { %p942_p10 = pnand %p945_p9, %p1202_p8 }
 0x1b0   : > { %p943_p11 = pneg %p942_p10 }
 0x1b2   : > { %1075 = dma.done.wait (%p943_p11), %s670_s9, 1152  }
 0x1b3   : > { %1077 = vsyncadd (%p943_p11), %s670_s9, 4294966144  ;;  %s18_s25 = sadd.s32 1, %s1108_s25   ;;  %s1355_s18 = smov %s1084_s19 }
 0x1b4   : > { %p15_p12 = scmp.ge.s32.totalorder %s18_s25, 10   ;;  %s1356_s19 = smov %s1088_s20 }
 0x1b5   : > { %s1357_s20 = smov %s1211_s11  ;;  %s1358_s21 = smov %s1100_s23 }
 0x1b6   : > { %s1359_s22 = smov %s1104_s24  ;;  %s1360_s23 = smov %s1363_s28 }
 0x1b7   : > { %s1361_s24 = smov %s1367_s29  ;;  %17 = sbr.rel (!%p15_p12) target bundleno = 5 (0x5), region = 87 }
 0x1bc   :  { %676 = vsyncpa [#allocation3], 1 }
 0x1bd   :  { %678 = vsyncpa [#allocation3 + $0x1], 1 }

</bundles_post_ra>
